<compile_context>
chip_gen: v7x
topology: tpu7x:2x2x1
jax: 0.10.0
libtpu: 0.0.40
codegen_flags: <defaults>
</compile_context>

<pallas_src>
import functools
import math

import jax
import jax.numpy as jnp
from jax.experimental import pallas as pl
from jax.experimental.pallas import tpu as pltpu

EPS = 1e-5


def _patch_merge_kernel(x_ref, we_ref, wo_ref, g_ref, b_ref, o_ref):
    """One grid step = rb merged rows = rb*W2 output tokens.

    x_ref : (rb, 2, W2, 2C)  contiguous input tile; dim 1 is the row parity hp
    we_ref: (2C, 2C)         weight half applied to even input rows (hp = 0)
    wo_ref: (2C, 2C)         weight half applied to odd  input rows (hp = 1)
    g_ref : (1, 2C)          LayerNorm gamma (f32)
    b_ref : (1, 2C)          LayerNorm beta  (f32)
    o_ref : (rb*W2, 2C)      output tokens
    """
    rb, _, w2, c2 = x_ref.shape
    m = rb * w2
    cdt = we_ref.dtype                       # matmul compute dtype (f32/bf16)

    # Static parity views of the contiguous tile (major-dim slices).
    xe = x_ref[:, 0].reshape(m, c2).astype(cdt)
    xo = x_ref[:, 1].reshape(m, c2).astype(cdt)

    # reduction: y = [x0|x1|x2|x3] @ W as two K=2C partial matmuls, f32 accum.
    y = jnp.dot(xe, we_ref[...], preferred_element_type=jnp.float32)
    y = y + jnp.dot(xo, wo_ref[...], preferred_element_type=jnp.float32)

    # LayerNorm(2C) in f32, two-pass mean / centered variance (torch-like).
    mean = jnp.mean(y, axis=-1, keepdims=True)
    yc = y - mean
    var = jnp.mean(yc * yc, axis=-1, keepdims=True)
    out = yc * jax.lax.rsqrt(var + EPS) * g_ref[...] + b_ref[...]
    o_ref[...] = out.astype(o_ref.dtype)


def prepare_patch_merging_params(w, gamma, beta, compute_dtype=None):
    """Hoisted (once-per-layer) weight re-order / cast.

    torch cat order is [x0, x1, x2, x3] = [(hp,wp)=(0,0), (1,0), (0,1), (1,1)];
    even input rows (hp=0) carry [x0 | x2], odd rows (hp=1) carry [x1 | x3].
    """
    w = jnp.asarray(w)
    four_c, two_c = w.shape
    C = four_c // 4
    if compute_dtype is None:
        compute_dtype = w.dtype
    w_even = jnp.concatenate([w[0 * C:1 * C], w[2 * C:3 * C]], axis=0)
    w_odd = jnp.concatenate([w[1 * C:2 * C], w[3 * C:4 * C]], axis=0)
    return dict(
        w_even=w_even.astype(compute_dtype),
        w_odd=w_odd.astype(compute_dtype),
        gamma=jnp.asarray(gamma, jnp.float32).reshape(1, two_c),
        beta=jnp.asarray(beta, jnp.float32).reshape(1, two_c),
    )


def _vmem_capacity_bytes():
    try:
        return int(pltpu.get_tpu_info().vmem_capacity_bytes)
    except Exception:
        return 64 * 2**20        # v7x has the smallest per-TensorCore VMEM


def _choose_rb(bh2, w2, cap):
    """Rows of B*H/2 per grid step.  rb*W2 must be a multiple of 8 (sublane)
    unless rb covers the full extent; prefer an even number of grid steps so
    v7x's two TensorCores get balanced halves."""
    r_align = 8 // math.gcd(8, w2)
    cap = max(1, min(bh2, cap))
    best = best_even = None
    for rb in range(r_align, cap + 1, r_align):
        if bh2 % rb == 0:
            best = rb
            if (bh2 // rb) % 2 == 0:
                best_even = rb
    if best is None:
        # No aligned divisor fits the budget: smallest aligned divisor, else
        # the full extent (a full-dim block is always a legal shape).
        for rb in range(r_align, bh2 + 1, r_align):
            if bh2 % rb == 0:
                return rb
        return bh2
    if best_even is not None and 2 * best_even >= best:
        return best_even          # even #steps unless it halves the block
    return best


def patch_merging_fwd(x, input_resolution, params, *,
                      vmem_budget_bytes=None, max_block_tokens=8192):
    """x: (B, L, C) with L = H*W; params from prepare_patch_merging_params.
    Returns (B, L//4, 2C) in x.dtype."""
    H, W = input_resolution
    B, L, C = x.shape
    assert L == H * W, "input feature has wrong size"
    assert H % 2 == 0 and W % 2 == 0, f"x size ({H}*{W}) should be even."
    H2, W2 = H // 2, W // 2
    BH2 = B * H2
    two_c = 2 * C

    w_even, w_odd = params["w_even"], params["w_odd"]
    g2, b2 = params["gamma"], params["beta"]
    assert w_even.shape == (two_c, two_c) and w_odd.shape == (two_c, two_c)

    # Free (metadata-only) view: (B, H*W, C) -> (B*H/2, 2, W/2, 2C).
    # Axis 1 is the row parity hp; the last dim packs [wp=0 | wp=1] * C.
    x_r = x.reshape(BH2, 2, W2, two_c)

    # ---- generation-aware tile sizing -----------------------------------
    capacity = _vmem_capacity_bytes()
    if vmem_budget_bytes is None:
        vmem_budget_bytes = int(capacity * 0.4)   # ~25 MiB v7x, ~51 MiB v5e/v6e
    bytes_x = jnp.dtype(x.dtype).itemsize
    bytes_w = jnp.dtype(w_even.dtype).itemsize
    D = two_c
    per_tok = (2 * D * bytes_x) * 2       # input tile, double buffered
    per_tok += (D * bytes_x) * 2          # output tile, double buffered
    per_tok += 2 * D * bytes_w            # xe / xo compute-dtype copies
    per_tok += 3 * D * 4                  # y / centered-y / out f32 temporaries
    fixed = 2 * (D * D * bytes_w) * 2 + 2 * (D * 4) * 2 + (1 << 20)  # w + g/b + slack
    max_tok = (vmem_budget_bytes - fixed) // per_tok
    max_tok = max(W2, min(max_tok, max_block_tokens))
    rb = _choose_rb(BH2, W2, max_tok // W2)
    grid = (BH2 // rb,)

    est = fixed + per_tok * rb * W2
    vmem_limit = int(min(max(32 * 2**20, est * 1.4), capacity * 0.9))

    out2d = pl.pallas_call(
        _patch_merge_kernel,
        out_shape=jax.ShapeDtypeStruct((BH2 * W2, two_c), x.dtype),
        grid_spec=pltpu.PrefetchScalarGridSpec(
            num_scalar_prefetch=0,
            grid=grid,
            in_specs=[
                # one contiguous DMA per step: (rb, 2, W2, 2C)
                pl.BlockSpec((rb, 2, W2, two_c), lambda i: (i, 0, 0, 0)),
                pl.BlockSpec((two_c, two_c), lambda i: (0, 0)),
                pl.BlockSpec((two_c, two_c), lambda i: (0, 0)),
                pl.BlockSpec((1, two_c), lambda i: (0, 0)),
                pl.BlockSpec((1, two_c), lambda i: (0, 0)),
            ],
            # unpadded output: last dim is the full array dim (legal block)
            out_specs=pl.BlockSpec((rb * W2, two_c), lambda i: (i, 0)),
        ),
        compiler_params=pltpu.CompilerParams(
            dimension_semantics=("parallel",),
            vmem_limit_bytes=vmem_limit,
        ),
    )(x_r, w_even, w_odd, g2, b2)

    # metadata-only reshape back to (B, H/2 * W/2, 2C)
    return out2d.reshape(B, H2 * W2, two_c)


def patch_merging(x, input_resolution, w, gamma, beta, *, compute_dtype=None,
                  vmem_budget_bytes=None, max_block_tokens=8192):
    """Convenience wrapper (param prep + kernel).  For repeated calls, hoist
    prepare_patch_merging_params out and call patch_merging_fwd directly."""
    if compute_dtype is None:
        compute_dtype = jnp.bfloat16 if x.dtype == jnp.bfloat16 else x.dtype
    params = prepare_patch_merging_params(w, gamma, beta, compute_dtype)
    return patch_merging_fwd(x, input_resolution, params,
                             vmem_budget_bytes=vmem_budget_bytes,
                             max_block_tokens=max_block_tokens)


def _reference(x, input_resolution, w, gamma, beta):
    H, W = input_resolution
    B, L, C = x.shape
    xv = x.reshape(B, H, W, C)
    x0 = xv[:, 0::2, 0::2, :]
    x1 = xv[:, 1::2, 0::2, :]
    x2 = xv[:, 0::2, 1::2, :]
    x3 = xv[:, 1::2, 1::2, :]
    xm = jnp.concatenate([x0, x1, x2, x3], axis=-1).reshape(B, -1, 4 * C)
    y = jnp.einsum("blk,kd->bld", xm, w)
    mean = jnp.mean(y, axis=-1, keepdims=True)
    var = jnp.mean((y - mean) ** 2, axis=-1, keepdims=True)
    return (y - mean) / jnp.sqrt(var + EPS) * gamma + beta


if __name__ == "__main__":
    # Module config: dim = C = 32, input_resolution = (16, 16), batch B = 2.
    B, H, W, C = 2, 16, 16, 32
    L = H * W

    key = jax.random.PRNGKey(0)
    kx, kw = jax.random.split(key)
    x = jax.random.normal(kx, (B, L, C), dtype=jnp.float32)

    # Linear(4C -> 2C, bias=False) weight and LayerNorm(2C) params.
    w = jax.random.normal(kw, (4 * C, 2 * C), dtype=jnp.float32) * 0.02
    gamma = jnp.ones((2 * C,), dtype=jnp.float32)
    beta = jnp.zeros((2 * C,), dtype=jnp.float32)

    ref = _reference(x, (H, W), w, gamma, beta)

    # f32 path (weight prep fused under the same jit as the kernel call).
    fwd = jax.jit(lambda x, w, g, b: patch_merging(x, (H, W), w, g, b))
    out = jax.block_until_ready(fwd(x, w, gamma, beta))
    assert out.shape == (B, L // 4, 2 * C), out.shape
    err = float(jnp.max(jnp.abs(out - ref)))
    assert jnp.allclose(out, ref, atol=1e-4, rtol=1e-4), err

    # Pre-prepared-params path (prep hoisted out of the per-call path).
    params = prepare_patch_merging_params(w, gamma, beta)
    fwd_prepared = jax.jit(lambda x, p: patch_merging_fwd(x, (H, W), p))
    out_p = jax.block_until_ready(fwd_prepared(x, params))
    assert jnp.allclose(out_p, ref, atol=1e-4, rtol=1e-4)

    # bf16 activation path: bf16 matmul on the MXU, LayerNorm in f32.
    out_bf = jax.block_until_ready(
        fwd(x.astype(jnp.bfloat16), w, gamma, beta))
    assert out_bf.shape == (B, L // 4, 2 * C)
    assert out_bf.dtype == jnp.bfloat16
    assert jnp.allclose(out_bf.astype(jnp.float32), ref, atol=2e-1, rtol=5e-2)

    print("KERNEL_OK")
</pallas_src>

<mosaic_0001>
module attributes {stable_mosaic.version = 11 : i64} {
  func.func @_patch_merge_kernel(%arg0: i32, %arg1: memref<8x2x8x64xf32, #tpu.memory_space<vmem>>, %arg2: memref<64x64xf32, #tpu.memory_space<vmem>>, %arg3: memref<64x64xf32, #tpu.memory_space<vmem>>, %arg4: memref<1x64xf32, #tpu.memory_space<vmem>>, %arg5: memref<1x64xf32, #tpu.memory_space<vmem>>, %arg6: memref<64x64xf32, #tpu.memory_space<vmem>>) attributes {dimension_semantics = [#tpu.dimension_semantics<parallel>], iteration_bounds = array<i64: 2>, scalar_prefetch = 0 : i64, scratch_operands = 0 : i64, tpu.core_type = #tpu.core_type<tc>, window_params = [{transform_indices = @transform_0, window_bounds = array<i64: 8, 2, 8, 64>}, {pipeline_mode = #tpu.pipeline_mode<synchronous>, transform_indices = @transform_1, window_bounds = array<i64: 64, 64>}, {pipeline_mode = #tpu.pipeline_mode<synchronous>, transform_indices = @transform_2, window_bounds = array<i64: 64, 64>}, {pipeline_mode = #tpu.pipeline_mode<synchronous>, transform_indices = @transform_3, window_bounds = array<i64: 1, 64>}, {pipeline_mode = #tpu.pipeline_mode<synchronous>, transform_indices = @transform_4, window_bounds = array<i64: 1, 64>}, {transform_indices = @transform_5, window_bounds = array<i64: 64, 64>}]} {
    %c0 = arith.constant 0 : index
    %c0_0 = arith.constant 0 : index
    %c0_1 = arith.constant 0 : index
    %c0_2 = arith.constant 0 : index
    %0 = vector.load %arg1[%c0, %c0_0, %c0_1, %c0_2] : memref<8x2x8x64xf32, #tpu.memory_space<vmem>>, vector<8x1x8x64xf32>
    %1 = vector.shape_cast %0 : vector<8x1x8x64xf32> to vector<8x8x64xf32>
    %2 = vector.shape_cast %1 : vector<8x8x64xf32> to vector<64x64xf32>
    %c0_3 = arith.constant 0 : index
    %c1 = arith.constant 1 : index
    %c0_4 = arith.constant 0 : index
    %c0_5 = arith.constant 0 : index
    %3 = vector.load %arg1[%c0_3, %c1, %c0_4, %c0_5] : memref<8x2x8x64xf32, #tpu.memory_space<vmem>>, vector<8x1x8x64xf32>
    %4 = vector.shape_cast %3 : vector<8x1x8x64xf32> to vector<8x8x64xf32>
    %5 = vector.shape_cast %4 : vector<8x8x64xf32> to vector<64x64xf32>
    %c0_6 = arith.constant 0 : index
    %c0_7 = arith.constant 0 : index
    %6 = vector.load %arg2[%c0_6, %c0_7] : memref<64x64xf32, #tpu.memory_space<vmem>>, vector<64x64xf32>
    %cst = arith.constant dense<0.000000e+00> : vector<64x64xf32>
    %7 = tpu.matmul %2, %6, %cst {dimension_numbers = #tpu.dot_dimension_numbers<[1], [0], [0], [1], [0, 0, 1, 1], [], []>} : vector<64x64xf32>, vector<64x64xf32>, vector<64x64xf32> -> vector<64x64xf32>
    %c0_8 = arith.constant 0 : index
    %c0_9 = arith.constant 0 : index
    %8 = vector.load %arg3[%c0_8, %c0_9] : memref<64x64xf32, #tpu.memory_space<vmem>>, vector<64x64xf32>
    %cst_10 = arith.constant dense<0.000000e+00> : vector<64x64xf32>
    %9 = tpu.matmul %5, %8, %cst_10 {dimension_numbers = #tpu.dot_dimension_numbers<[1], [0], [0], [1], [0, 0, 1, 1], [], []>} : vector<64x64xf32>, vector<64x64xf32>, vector<64x64xf32> -> vector<64x64xf32>
    %10 = arith.addf %7, %9 : vector<64x64xf32>
    %cst_11 = arith.constant dense<0.000000e+00> : vector<64xf32>
    %11 = vector.multi_reduction <add>, %10, %cst_11 [1] : vector<64x64xf32> to vector<64xf32>
    %12 = vector.shape_cast %11 : vector<64xf32> to vector<64x1xf32>
    %cst_12 = arith.constant 6.400000e+01 : f32
    %13 = vector.broadcast %cst_12 : f32 to vector<64x1xf32>
    %14 = arith.divf %12, %13 : vector<64x1xf32>
    %15 = vector.broadcast %14 : vector<64x1xf32> to vector<64x64xf32>
    %16 = arith.subf %10, %15 : vector<64x64xf32>
    %17 = arith.mulf %16, %16 : vector<64x64xf32>
    %cst_13 = arith.constant dense<0.000000e+00> : vector<64xf32>
    %18 = vector.multi_reduction <add>, %17, %cst_13 [1] : vector<64x64xf32> to vector<64xf32>
    %19 = vector.shape_cast %18 : vector<64xf32> to vector<64x1xf32>
    %cst_14 = arith.constant 6.400000e+01 : f32
    %20 = vector.broadcast %cst_14 : f32 to vector<64x1xf32>
    %21 = arith.divf %19, %20 : vector<64x1xf32>
    %cst_15 = arith.constant 9.99999974E-6 : f32
    %22 = vector.broadcast %cst_15 : f32 to vector<64x1xf32>
    %23 = arith.addf %21, %22 : vector<64x1xf32>
    %24 = math.rsqrt %23 : vector<64x1xf32>
    %25 = vector.broadcast %24 : vector<64x1xf32> to vector<64x64xf32>
    %26 = arith.mulf %16, %25 : vector<64x64xf32>
    %c0_16 = arith.constant 0 : index
    %c0_17 = arith.constant 0 : index
    %27 = vector.load %arg4[%c0_16, %c0_17] : memref<1x64xf32, #tpu.memory_space<vmem>>, vector<1x64xf32>
    %28 = vector.broadcast %27 : vector<1x64xf32> to vector<64x64xf32>
    %29 = arith.mulf %26, %28 : vector<64x64xf32>
    %c0_18 = arith.constant 0 : index
    %c0_19 = arith.constant 0 : index
    %30 = vector.load %arg5[%c0_18, %c0_19] : memref<1x64xf32, #tpu.memory_space<vmem>>, vector<1x64xf32>
    %31 = vector.broadcast %30 : vector<1x64xf32> to vector<64x64xf32>
    %32 = arith.addf %29, %31 : vector<64x64xf32>
    %c0_20 = arith.constant 0 : index
    %c0_21 = arith.constant 0 : index
    %33 = vector.load %arg6[%c0_20, %c0_21] : memref<64x64xf32, #tpu.memory_space<vmem>>, vector<64x64xf32>
    tpu.vector_store %arg6[%c0_20, %c0_21], %32 {strides = array<i32>} : memref<64x64xf32, #tpu.memory_space<vmem>>, vector<64x64xf32>,
    return
  }
  func.func @transform_0(%arg0: i32) -> (i32, i32, i32, i32) {
    %c0_i32 = arith.constant 0 : i32
    %c0_i32_0 = arith.constant 0 : i32
    %c0_i32_1 = arith.constant 0 : i32
    %c0_i32_2 = arith.constant 0 : i32
    return %arg0, %c0_i32, %c0_i32_0, %c0_i32_1 : i32, i32, i32, i32
  }
  func.func @transform_1(%arg0: i32) -> (i32, i32) {
    %c0_i32 = arith.constant 0 : i32
    %c0_i32_0 = arith.constant 0 : i32
    %c0_i32_1 = arith.constant 0 : i32
    return %c0_i32, %c0_i32_0 : i32, i32
  }
  func.func @transform_2(%arg0: i32) -> (i32, i32) {
    %c0_i32 = arith.constant 0 : i32
    %c0_i32_0 = arith.constant 0 : i32
    %c0_i32_1 = arith.constant 0 : i32
    return %c0_i32, %c0_i32_0 : i32, i32
  }
  func.func @transform_3(%arg0: i32) -> (i32, i32) {
    %c0_i32 = arith.constant 0 : i32
    %c0_i32_0 = arith.constant 0 : i32
    %c0_i32_1 = arith.constant 0 : i32
    return %c0_i32, %c0_i32_0 : i32, i32
  }
  func.func @transform_4(%arg0: i32) -> (i32, i32) {
    %c0_i32 = arith.constant 0 : i32
    %c0_i32_0 = arith.constant 0 : i32
    %c0_i32_1 = arith.constant 0 : i32
    return %c0_i32, %c0_i32_0 : i32, i32
  }
  func.func @transform_5(%arg0: i32) -> (i32, i32) {
    %c0_i32 = arith.constant 0 : i32
    %c0_i32_0 = arith.constant 0 : i32
    return %arg0, %c0_i32 : i32, i32
  }
}

</mosaic_0001>

<bundles_post_ra>
// kernel: _lambda_.1
= control target key start
LH: loop header
LB: loop body
LE: loop exit
PB: predicated region body
PF: predicated region fallthrough
CT: control target
= control target key end

     0   :  { %10 = vsyncpa [#allocation3], 0  ;;  %s1332_s0 = inlined_call_operand.vmem [shape: f32[16,2,8,64], index: 0, kind: input, shape index: {}]   ;;  %s1333_s1 = inlined_call_operand.vmem [shape: f32[64,64], index: 1, kind: input, shape index: {}]   ;;  %s1334_s2 = inlined_call_operand.vmem [shape: f32[64,64], index: 2, kind: input, shape index: {}]   ;;  %s1335_s3 = inlined_call_operand.vmem [shape: f32[1,64], index: 3, kind: input, shape index: {}]   ;;  %s1336_s4 = inlined_call_operand.vmem [shape: f32[1,64], index: 4, kind: input, shape index: {}]   ;;  %s1337_s5 = inlined_call_operand.hbm [shape: f32[128,64], index: 5, kind: output, shape index: {}]  }
   0x1   :  { %12 = vsyncpa [#allocation3 + $0x1], 0  ;;  %s1063_s18 = smov 0   ;;  %s1065_s19 = smov 0  }
   0x2   :  { %s1067_s20 = smov 0   ;;  %s1069_s21 = smov 0  }
   0x3 LB: > { %s1084_s22 = sadd.s32 4294967295, %s1028_s21   ;;  %s740_s23 = sadd.s32 4294967294, %s1028_s21   ;;  %s1028_s21 = sphi %s1069_s21, %s1343_s21   ;;  %s1024_s20 = sphi %s1067_s20, %s1342_s20   ;;  %s1020_s19 = sphi %s1065_s19, %s1341_s19   ;;  %s1016_s18 = sphi %s1063_s18, %s1340_s18  }
   0x4   : > { %s1088_s24 = sadd.s32 1, %s1028_s21   ;;  %s135_s25 = sadd.s32 1, %s1024_s20 }
   0x5   : > { %s132_s26 = ssub.s32 %s1028_s21, %s1088_s24  ;;  %p145_p0 = scmp.ne.s32.totalorder %s1024_s20, %s1020_s19 }
   0x6   : > { %p133_p1 = scmp.eq.s32.totalorder %s132_s26, 0  ;;  %p146_p2 = scmp.eq.s32.totalorder %s1084_s22, 1 }
   0x7   : > { %p151_p3 = scmp.ne.s32.totalorder %s1020_s19, %s1016_s18  ;;  %p152_p4 = scmp.eq.s32.totalorder %s740_s23, 1 }
   0x8   : > { %s1099_s27 = scalar_select %p133_p1, %s1024_s20, %s135_s25  }
   0x9   : > { %p1101_p5 = por %p146_p2, %p145_p0  ;;  %p1105_p6 = por %p152_p4, %p151_p3 }
   0xa   : > { %p743_p7 = scmp.ge.s32.totalorder %s1028_s21, 1  ;;  %p192_p8 = scmp.lt.s32.totalorder %s1028_s21, 3 }
   0xc   : > { %p193_p9 = pnand %p743_p7, %p192_p8 }
   0xd   : > { %v254_v0 = vld [vmem:[%s1334_s2] sm:$0xff] (!%p193_p9)  ;;  %v255_v1 = vld [vmem:[%s1334_s2 + $0x8] sm:$0xff] (!%p193_p9)  ;;  %s745_s11 = sshll.u32 (!%p193_p9), %s1084_s22, 3  ;;  %v256_v5 = vld [vmem:[%s1334_s2 + $0x10] sm:$0xff] (!%p193_p9)  ;;  %vm262_vm0 = vcmask (!%p193_p9), 523264   ;;  %s218_s10 = sand.u32 (!%p193_p9), 1, %s1020_s19  }
   0xe   : > { %196 = sbr.rel (%p193_p9) target bundleno = 592 (0x250), region = 40  ;;  %v246_v2 = vld [vmem:[%s1333_s1] sm:$0xff] (!%p193_p9)  ;;  %v869_v3 = vpack.c.bf16 (!%p193_p9), %v255_v1, %v254_v0  ;;  %v247_v4 = vld [vmem:[%s1333_s1 + $0x8] sm:$0xff] (!%p193_p9)  ;;  %v257_v6 = vld [vmem:[%s1334_s2 + $0x18] sm:$0xff] (!%p193_p9)  ;;  %p222_p10 = scmp.lt.s32.totalorder (!%p193_p9), %s745_s11, 15 }
   0xf   : > { %v885_v7 = vpack.c.bf16 (!%p193_p9), %v247_v4, %v246_v2  ;;  %v873_v8 = vpack.c.bf16 (!%p193_p9), %v257_v6, %v256_v5  ;;  %v248_v9 = vld [vmem:[%s1333_s1 + $0x10] sm:$0xff] (!%p193_p9)  ;;  %v249_v10 = vld [vmem:[%s1333_s1 + $0x18] sm:$0xff] (!%p193_p9)  ;;  %v258_v11 = vld [vmem:[%s1334_s2 + $0x20] sm:$0xff] (!%p193_p9)  ;;  %s744_s14 = sshll.u32 (!%p193_p9), %s218_s10, 6  ;;  %s780_s23 = sshll.u32 (!%p193_p9), %s1084_s22, 10 }
  0x10   : > { %870 = vmatprep.subr.bf16.mxu1 (!%p193_p9), %v869_v3  ;;  %v889_v12 = vpack.c.bf16 (!%p193_p9), %v249_v10, %v248_v9  ;;  %v259_v13 = vld [vmem:[%s1334_s2 + $0x28] sm:$0xff] (!%p193_p9)  ;;  %v250_v14 = vld [vmem:[%s1333_s1 + $0x20] sm:$0xff] (!%p193_p9)  ;;  %v260_v18 = vld [vmem:[%s1334_s2 + $0x30] sm:$0xff] (!%p193_p9)  ;;  %s1257_s17 = scalar_lea.vmem (!%p193_p9), [#allocation2], %s744_s14  ;;  %s1281_s6 = scalar_lea.hbm (!%p193_p9), %s1337_s5, %s780_s23 }
  0x11   : > { %v251_v15 = vld [vmem:[%s1333_s1 + $0x28] sm:$0xff] (!%p193_p9)  ;;  %886 = vmatprep.subr.bf16.mxu0 (!%p193_p9), %v885_v7  ;;  %872 = vmatpush3.bf16.msra.mxu1 (!%p193_p9), %v869_v3  ;;  %v877_v16 = vpack.c.bf16 (!%p193_p9), %v259_v13, %v258_v11  ;;  %v261_v19 = vld [vmem:[%s1334_s2 + $0x38] sm:$0xff] (!%p193_p9)  ;;  %v252_v20 = vld [vmem:[%s1333_s1 + $0x30] sm:$0xff] (!%p193_p9)  ;;  %s678_s25 = sshll.u32 (!%p193_p9), %s1257_s17, 4  ;;  %s1291_s22 = scalar_lea.sflag (!%p193_p9), [#allocation3], %s218_s10  ;;  %s1283_s25 = int_to_ptr.vmem [resolvable:$true] %s678_s25 }
  0x12   : > { %888 = vmatpush3.bf16.msra.mxu0 (!%p193_p9), %v885_v7  ;;  %874 = vmatprep.subr.bf16.mxu1 (!%p193_p9), %v873_v8  ;;  %v893_v17 = vpack.c.bf16 (!%p193_p9), %v251_v15, %v250_v14  ;;  %v253_v21 = vld [vmem:[%s1333_s1 + $0x38] sm:$0xff] (!%p193_p9)  ;;  %v881_v24 = vpack.c.bf16 (!%p193_p9), %v261_v19, %v260_v18  ;;  %s966_s7 = scalar_lea.vmem (!%p193_p9), %s1283_s25, 1024 }
  0x13   : > { %890 = vmatprep.subr.bf16.mxu0 (!%p193_p9), %v889_v12  ;;  %v897_v25 = vpack.c.bf16 (!%p193_p9), %v253_v21, %v252_v20  ;;  %p967_p11 = scmp.ne.s32.totalorder (!%p193_p9), %s1283_s25, %s966_s7 }
  0x15   : > { %s1345_s11 = smov (!%p222_p10, %s745_s11), 15  ;;  %876 = vmatpush3.bf16.msra.mxu1 %v873_v8  ;;  %p968_p12 = pnand %p967_p11, %p1101_p5 }
  0x16   : > { %s779_s15 = sshll.u32 %s1345_s11, 4  ;;  %892 = vmatpush3.bf16.msra.mxu0 %v889_v12  ;;  %878 = vmatprep.subr.bf16.mxu1 %v877_v16 }
  0x17   : > { %s1160_s8 = scalar_lea.vmem %s1332_s0, %s779_s15  ;;  %894 = vmatprep.subr.bf16.mxu0 %v893_v17  ;;  %p969_p13 = pneg %p968_p12 }
  0x18   : > { %v748_v22 = vld [vmem:[%s1160_s8 + $0x8] sm:$0xff]  ;;  %v229_v23 = vld [vmem:[%s1160_s8] sm:$0xff]  ;;  %v749_v26 = vld [vmem:[%s1160_s8 + $0x18] sm:$0xff] }
  0x19   : > { %829 = vmatprep.mubr.msk.f32.mxu1 %vm262_vm0, %v748_v22  ;;  %857 = vmatprep.mubr.msk.f32.mxu0 %vm262_vm0, %v229_v23  ;;  %v230_v27 = vld [vmem:[%s1160_s8 + $0x10] sm:$0xff]  ;;  %v750_v28 = vld [vmem:[%s1160_s8 + $0x28] sm:$0xff]  ;;  %v231_v29 = vld [vmem:[%s1160_s8 + $0x20] sm:$0xff] }
  0x1a   : > { %880 = vmatpush3.bf16.msra.mxu1 %v877_v16  ;;  %896 = vmatpush3.bf16.msra.mxu0 %v893_v17  ;;  %v751_v30 = vld [vmem:[%s1160_s8 + $0x38] sm:$0xff]  ;;  %v232_v31 = vld [vmem:[%s1160_s8 + $0x30] sm:$0xff]  ;;  %v752_v32 = vld [vmem:[%s1160_s8 + $0x48] sm:$0xff] }
  0x1b   : > { %882 = vmatprep.subr.bf16.mxu1 %v881_v24  ;;  %898 = vmatprep.subr.bf16.mxu0 %v897_v25  ;;  %v233_v33 = vld [vmem:[%s1160_s8 + $0x40] sm:$0xff]  ;;  %v753_v34 = vld [vmem:[%s1160_s8 + $0x58] sm:$0xff]  ;;  %v234_v35 = vld [vmem:[%s1160_s8 + $0x50] sm:$0xff] }
  0x1c   : > { %v754_v36 = vld [vmem:[%s1160_s8 + $0x68] sm:$0xff]  ;;  %v235_v37 = vld [vmem:[%s1160_s8 + $0x60] sm:$0xff]  ;;  %v755_v38 = vld [vmem:[%s1160_s8 + $0x78] sm:$0xff] }
  0x1d   : > { %v236_v39 = vld [vmem:[%s1160_s8 + $0x70] sm:$0xff]  ;;  %s1030_s8 = smov [#allocation2]  }
  0x1e   : > { %884 = vmatpush3.bf16.msra.mxu1 %v881_v24  ;;  %900 = vmatpush3.bf16.msra.mxu0 %v897_v25  ;;  %s970_s11 = sshll.u32 %s1030_s8, 4  ;;  %s971_s11 = int_to_ptr.vmem [resolvable:$false] %s970_s11 }
  0x1f   : > { %s972_s9 = scalar_lea.vmem %s971_s11, 2048  ;;  %p973_p0 = scmp.lt.s32.totalorder %s1283_s25, %s971_s11 }
  0x20   : > { %p974_p1 = scmp.lt.s32.totalorder %s972_s9, %s966_s7 }
  0x21   : > { %830 = vmatmul.mubr.msk.f32.vlgmr.msra.gmra.mrb[0].mxu1 %vm262_vm0, %v749_v26  ;;  %858 = vmatmul.mubr.msk.f32.vlgmr.msra.gmra.mrb[0].mxu0 %vm262_vm0, %v230_v27 }
  0x22   : > { %832 = vmatprep.mubr.msk.f32.mxu1 %vm262_vm0, %v750_v28  ;;  %860 = vmatprep.mubr.msk.f32.mxu0 %vm262_vm0, %v231_v29  ;;  %p975_p2 = por %p974_p1, %p973_p0 }
  0x24   : > { %p976_p3 = pnand %p975_p2, %p969_p13 }
  0x25   : > { %833 = vmatmul.mubr.msk.f32.gmra.mrb[2].mxu1 %vm262_vm0, %v751_v30  ;;  %861 = vmatmul.mubr.msk.f32.gmra.mrb[2].mxu0 %vm262_vm0, %v232_v31 }
  0x26   : > { %835 = vmatprep.mubr.msk.f32.mxu1 %vm262_vm0, %v752_v32  ;;  %863 = vmatprep.mubr.msk.f32.mxu0 %vm262_vm0, %v233_v33 }
  0x29   : > { %836 = vmatmul.mubr.msk.f32.gmra.mrb[4].mxu1 %vm262_vm0, %v753_v34  ;;  %864 = vmatmul.mubr.msk.f32.gmra.mrb[4].mxu0 %vm262_vm0, %v234_v35 }
  0x2a   : > { %838 = vmatprep.mubr.msk.f32.mxu1 %vm262_vm0, %v754_v36  ;;  %866 = vmatprep.mubr.msk.f32.mxu0 %vm262_vm0, %v235_v37 }
  0x2d   : > { %839 = vmatmul.mubr.msk.f32.gmra.mrb[6].mxu1 %vm262_vm0, %v755_v38  ;;  %867 = vmatmul.mubr.msk.f32.gmra.mrb[6].mxu0 %vm262_vm0, %v236_v39 }
  0xf4   : > { %v831_v40 = vpop.f32.mrb[0].mxu1  ;;  %v859_v41 = vpop.f32.mrb[0].mxu0 }
  0xf5   : > { %v353_v42 = vpop.f32.mrb[1].mxu1  ;;  %v488_v43 = vadd.f32 %v859_v41, %v831_v40  ;;  %v482_v44 = vpop.f32.mrb[1].mxu0 }
  0xf6   : > { %v483_v45 = vadd.f32 %v482_v44, %v353_v42 }
  0xf7   : > { %v524_v47 = vsel %vm262_vm0, %v488_v43, 0.0 }
  0xf8   : > { %v834_v46 = vpop.f32.mrb[2].mxu1  ;;  %525 = vadd.xlane.f32.xlu0 %v524_v47  ;;  %v862_v48 = vpop.f32.mrb[2].mxu0  ;;  %v521_v55 = vsel %vm262_vm0, %v483_v45, 0.0 }
  0xf9   : > { %v363_v49 = vpop.f32.mrb[3].mxu1  ;;  %v498_v50 = vadd.f32 %v862_v48, %v834_v46  ;;  %v492_v51 = vpop.f32.mrb[3].mxu0 }
  0xfa   : > { %v493_v52 = vadd.f32 %v492_v51, %v363_v49 }
  0xfb   : > { %v530_v54 = vsel %vm262_vm0, %v498_v50, 0.0 }
  0xfc   : > { %v837_v53 = vpop.f32.mrb[4].mxu1  ;;  %531 = vadd.xlane.f32.xlu1 %v530_v54  ;;  %v865_v56 = vpop.f32.mrb[4].mxu0  ;;  %522 = vadd.xlane.f32.xlu0 %v521_v55  ;;  %v527_v62 = vsel %vm262_vm0, %v493_v52, 0.0 }
  0xfd   : > { %v373_v57 = vpop.f32.mrb[5].mxu1  ;;  %v508_v58 = vadd.f32 %v865_v56, %v837_v53  ;;  %v502_v59 = vpop.f32.mrb[5].mxu0 }
  0xfe   : > { %v503_v60 = vadd.f32 %v502_v59, %v373_v57 }
  0xff   : > { %v536_v4 = vsel %vm262_vm0, %v508_v58, 0.0 }
 0x100   : > { %v840_v61 = vpop.f32.mrb[6].mxu1  ;;  %v868_v63 = vpop.f32.mrb[6].mxu0  ;;  %528 = vadd.xlane.f32.xlu1 %v527_v62  ;;  %v533_v1 = vsel %vm262_vm0, %v503_v60, 0.0 }
 0x101   : > { %v383_v0 = vpop.f32.mrb[7].mxu1  ;;  %v518_v2 = vadd.f32 %v868_v63, %v840_v61  ;;  %v512_v3 = vpop.f32.mrb[7].mxu0  ;;  %534 = vadd.xlane.f32.xlu0 %v533_v1  ;;  %v772_v1 = vld [vmem:[%s1335_s3] ss:$0 sm:$0xff] }
 0x102   : > { %v513_v5 = vadd.f32 %v512_v3, %v383_v0 }
 0x103   : > { %v542_v7 = vsel %vm262_vm0, %v518_v2, 0.0 }
 0x104   : > { %537 = vadd.xlane.f32.xlu1 %v536_v4  ;;  %v539_v6 = vsel %vm262_vm0, %v513_v5, 0.0 }
 0x105   : > { %540 = vadd.xlane.f32.xlu0 %v539_v6 }
 0x108   : > { %543 = vadd.xlane.f32.xlu1 %v542_v7  ;;  %v773_v7 = vld [vmem:[%s1336_s4] ss:$0 sm:$0xff] }
 0x185   : > { %v526_v8 = vpop.xlane.xlu0 %525 }
 0x186   : > { %v547_v9 = vmul.f32 0.015625, %v526_v8 }
 0x188   : > { %v1205_v10 = vsub.f32 %v488_v43, %v547_v9 }
 0x189   : > { %v532_v11 = vpop.xlane.xlu1 %531  ;;  %v523_v12 = vpop.xlane.xlu0 %522 }
 0x18a   : > { %v549_v13 = vmul.f32 0.015625, %v532_v11  ;;  %v546_v14 = vmul.f32 0.015625, %v523_v12  ;;  %v563_v15 = vmul.f32 %v1205_v10, %v1205_v10 }
 0x18c   : > { %v1209_v16 = vsub.f32 %v498_v50, %v549_v13  ;;  %v1211_v17 = vsub.f32 %v483_v45, %v546_v14  ;;  %v573_v18 = vsel %vm262_vm0, %v563_v15, 0.0 }
 0x18d   : > { %574 = vadd.xlane.f32.xlu1 %v573_v18  ;;  %v529_v19 = vpop.xlane.xlu1 %528 }
 0x18e   : > { %v548_v20 = vmul.f32 0.015625, %v529_v19  ;;  %v535_v21 = vpop.xlane.xlu0 %534  ;;  %v565_v22 = vmul.f32 %v1209_v16, %v1209_v16  ;;  %v562_v23 = vmul.f32 %v1211_v17, %v1211_v17 }
 0x18f   : > { %v550_v24 = vmul.f32 0.015625, %v535_v21 }
 0x190   : > { %v1218_v25 = vsub.f32 %v493_v52, %v548_v20  ;;  %v579_v26 = vsel %vm262_vm0, %v565_v22, 0.0  ;;  %v570_v27 = vsel %vm262_vm0, %v562_v23, 0.0 }
 0x191   : > { %v1222_v28 = vsub.f32 %v503_v60, %v550_v24  ;;  %580 = vadd.xlane.f32.xlu1 %v579_v26  ;;  %v538_v29 = vpop.xlane.xlu1 %537  ;;  %571 = vadd.xlane.f32.xlu0 %v570_v27 }
 0x192   : > { %v551_v30 = vmul.f32 0.015625, %v538_v29  ;;  %v541_v31 = vpop.xlane.xlu0 %540  ;;  %v564_v32 = vmul.f32 %v1218_v25, %v1218_v25 }
 0x193   : > { %v552_v33 = vmul.f32 0.015625, %v541_v31  ;;  %v566_v36 = vmul.f32 %v1222_v28, %v1222_v28 }
 0x194   : > { %v1226_v34 = vsub.f32 %v508_v58, %v551_v30  ;;  %v576_v35 = vsel %vm262_vm0, %v564_v32, 0.0 }
 0x195   : > { %v1231_v37 = vsub.f32 %v513_v5, %v552_v33  ;;  %v544_v38 = vpop.xlane.xlu1 %543  ;;  %577 = vadd.xlane.f32.xlu0 %v576_v35  ;;  %v582_v43 = vsel %vm262_vm0, %v566_v36, 0.0 }
 0x196   : > { %v553_v39 = vmul.f32 0.015625, %v544_v38  ;;  %v567_v40 = vmul.f32 %v1226_v34, %v1226_v34 }
 0x197   : > { %v568_v44 = vmul.f32 %v1231_v37, %v1231_v37 }
 0x198   : > { %v1235_v41 = vsub.f32 %v518_v2, %v553_v39  ;;  %v585_v42 = vsel %vm262_vm0, %v567_v40, 0.0 }
 0x199   : > { %586 = vadd.xlane.f32.xlu1 %v585_v42  ;;  %583 = vadd.xlane.f32.xlu0 %v582_v43  ;;  %v588_v47 = vsel %vm262_vm0, %v568_v44, 0.0 }
 0x19a   : > { %v569_v45 = vmul.f32 %v1235_v41, %v1235_v41 }
 0x19c   : > { %v591_v46 = vsel %vm262_vm0, %v569_v45, 0.0 }
 0x19d   : > { %592 = vadd.xlane.f32.xlu1 %v591_v46  ;;  %589 = vadd.xlane.f32.xlu0 %v588_v47 }
 0x21a   : > { %v575_v48 = vpop.xlane.xlu1 %574 }
 0x21b   : > { %v595_v49 = vmul.f32 0.015625, %v575_v48 }
 0x21d   : > { %v603_v50 = vadd.f32 1e-05, %v595_v49 }
 0x21e   : > { %v581_v51 = vpop.xlane.xlu1 %580  ;;  %v572_v52 = vpop.xlane.xlu0 %571 }
 0x21f   : > { %950 = vrsqrt.f32 %v603_v50  ;;  %v597_v53 = vmul.f32 0.015625, %v581_v51  ;;  %v594_v54 = vmul.f32 0.015625, %v572_v52 }
 0x221   : > { %v605_v55 = vadd.f32 1e-05, %v597_v53  ;;  %v602_v56 = vadd.f32 1e-05, %v594_v54 }
 0x222   : > { %v578_v57 = vpop.xlane.xlu0 %577 }
 0x223   : > { %952 = vrsqrt.f32 %v605_v55  ;;  %v596_v58 = vmul.f32 0.015625, %v578_v57 }
 0x224   : > { %954 = vrsqrt.f32 %v602_v56 }
 0x225   : > { %v604_v59 = vadd.f32 1e-05, %v596_v58 }
 0x226   : > { %v587_v60 = vpop.xlane.xlu1 %586  ;;  %v584_v61 = vpop.xlane.xlu0 %583 }
 0x227   : > { %956 = vrsqrt.f32 %v604_v59  ;;  %v599_v62 = vmul.f32 0.015625, %v587_v60  ;;  %v598_v63 = vmul.f32 0.015625, %v584_v61 }
 0x229   : > { %v951_v0 = vpop.eup %950  ;;  %v607_v2 = vadd.f32 1e-05, %v599_v62  ;;  %v606_v3 = vadd.f32 1e-05, %v598_v63 }
 0x22a   : > { %v619_v4 = vmul.f32 %v951_v0, %v1205_v10  ;;  %v593_v5 = vpop.xlane.xlu1 %592  ;;  %v590_v6 = vpop.xlane.xlu0 %589 }
 0x22b   : > { %958 = vrsqrt.f32 %v607_v2  ;;  %v601_v8 = vmul.f32 0.015625, %v593_v5  ;;  %v600_v9 = vmul.f32 0.015625, %v590_v6 }
 0x22c   : > { %v634_v11 = vmul.f32 %v772_v1, %v619_v4  ;;  %960 = vrsqrt.f32 %v606_v3 }
 0x22d   : > { %v953_v12 = vpop.eup %952  ;;  %v609_v13 = vadd.f32 1e-05, %v601_v8  ;;  %v608_v14 = vadd.f32 1e-05, %v600_v9 }
 0x22e   : > { %v955_v15 = vpop.eup %954  ;;  %v649_v18 = vadd.f32 %v773_v7, %v634_v11  ;;  %v621_v19 = vmul.f32 %v953_v12, %v1209_v16 }
 0x22f   : > { %v618_v10 = vmul.f32 %v955_v15, %v1211_v17  ;;  %962 = vrsqrt.f32 %v609_v13 }
 0x230   : > { %657 = vst.msk [vmem:[%s1257_s17 + $0x8] sm:$0xff] %vm262_vm0, %v649_v18  ;;  %v636_v20 = vmul.f32 %v772_v1, %v621_v19  ;;  %964 = vrsqrt.f32 %v608_v14 }
 0x231   : > { %v957_v21 = vpop.eup %956  ;;  %v633_v22 = vmul.f32 %v772_v1, %v618_v10 }
 0x232   : > { %v651_v23 = vadd.f32 %v773_v7, %v636_v20  ;;  %v620_v24 = vmul.f32 %v957_v21, %v1218_v25 }
 0x233   : > { %v648_v26 = vadd.f32 %v773_v7, %v633_v22 }
 0x234   : > { %659 = vst.msk [vmem:[%s1257_s17 + $0x18] sm:$0xff] %vm262_vm0, %v651_v23  ;;  %v635_v16 = vmul.f32 %v772_v1, %v620_v24 }
 0x235   : > { %v959_v17 = vpop.eup %958  ;;  %656 = vst.msk [vmem:[%s1257_s17] sm:$0xff] %vm262_vm0, %v648_v26 }
 0x236   : > { %v961_v27 = vpop.eup %960  ;;  %v650_v29 = vadd.f32 %v773_v7, %v635_v16  ;;  %v623_v30 = vmul.f32 %v959_v17, %v1226_v34 }
 0x237   : > { %v622_v31 = vmul.f32 %v961_v27, %v1222_v28 }
 0x238   : > { %658 = vst.msk [vmem:[%s1257_s17 + $0x10] sm:$0xff] %vm262_vm0, %v650_v29  ;;  %v638_v25 = vmul.f32 %v772_v1, %v623_v30 }
 0x239   : > { %v963_v32 = vpop.eup %962  ;;  %v637_v33 = vmul.f32 %v772_v1, %v622_v31 }
 0x23a   : > { %v965_v35 = vpop.eup %964  ;;  %v653_v36 = vadd.f32 %v773_v7, %v638_v25  ;;  %v625_v38 = vmul.f32 %v963_v32, %v1235_v41 }
 0x23b   : > { %v652_v39 = vadd.f32 %v773_v7, %v637_v33  ;;  %v624_v40 = vmul.f32 %v965_v35, %v1231_v37 }
 0x23c   : > { %661 = vst.msk [vmem:[%s1257_s17 + $0x28] sm:$0xff] %vm262_vm0, %v653_v36  ;;  %v640_v28 = vmul.f32 %v772_v1, %v625_v38 }
 0x23d   : > { %660 = vst.msk [vmem:[%s1257_s17 + $0x20] sm:$0xff] %vm262_vm0, %v652_v39  ;;  %v639_v34 = vmul.f32 %v772_v1, %v624_v40 }
 0x23e   : > { %v655_v42 = vadd.f32 %v773_v7, %v640_v28 }
 0x23f   : > { %v654_v37 = vadd.f32 %v773_v7, %v639_v34 }
 0x240   : > { %663 = vst.msk [vmem:[%s1257_s17 + $0x38] sm:$0xff] %vm262_vm0, %v655_v42 }
 0x241   : > { %662 = vst.msk [vmem:[%s1257_s17 + $0x30] sm:$0xff] %vm262_vm0, %v654_v37 }
 0x242   : > { %979 = shalt.err (!%p976_p3)
}
 0x243   : > { %s980_s10 = scalar_lea.hbm %s1281_s6, 1024  ;;  %s984_s14 = scalar_lea.hbm %s1337_s5, 2048 }
 0x244   : > { %p981_p4 = scmp.ne.s32.totalorder %s1281_s6, %s980_s10  ;;  %p985_p9 = scmp.lt.u32.totalorder %s1281_s6, %s1337_s5 }
 0x245   : > { %p986_p10 = scmp.lt.u32.totalorder %s984_s14, %s980_s10  ;;  %p988_p12 = scmp.lt.u32.totalorder %s980_s10, %s1281_s6 }
 0x246   : > { %p982_p7 = pnand %p981_p4, %p1101_p5 }
 0x247   : > { %p987_p11 = por %p986_p10, %p985_p9 }
 0x248   : > { %p983_p8 = pneg %p982_p7 }
 0x249   : > { %p989_p13 = por %p988_p12, %p987_p11 }
 0x24b   : > { %p990_p0 = pnand %p989_p13, %p983_p8 }
 0x24d   : > { %993 = shalt.err (!%p990_p0)
}
 0x24e   : > { %s1031_s17 = smov 128   ;;  %s1032_s23 = smov 8  }
 0x24f   : > { %909 = dma.vmem_to_hbm [thread:$0]  (%p1101_p5), %s1283_s25, 1024, %s1281_s6, %s1291_s22, %s1031_s17, %s1031_s17, %s1032_s23  }
 0x250 PF: > { %p915_p1 = scmp.ge.s32.totalorder %s1028_s21, 2  ;;  %s693_s26 = sand.u32 1, %s1016_s18  }
 0x251   : > { %s694_s30 = scalar_lea.sflag [#allocation3], %s693_s26 }
 0x252   : > { %p912_p2 = pnand %p915_p1, %p1105_p6 }
 0x254   : > { %1011 = dma.done.wait (!%p912_p2), %s694_s30, 1024  }
 0x255   : > { %1013 = vsyncadd (!%p912_p2), %s694_s30, 4294966272  ;;  %p15_p3 = scmp.ge.s32.totalorder %s1088_s24, 4   ;;  %s1340_s18 = smov %s1020_s19 }
 0x256   : > { %s1341_s19 = smov %s1024_s20  ;;  %s1342_s20 = smov %s1099_s27 }
 0x257   : > { %s1343_s21 = smov %s1088_s24  ;;  %17 = sbr.rel (!%p15_p3) target bundleno = 3 (0x3), region = 76 }
 0x25e   :  { %699 = vsyncpa [#allocation3], 1 }
 0x25f   :  { %701 = vsyncpa [#allocation3 + $0x1], 1 }

</bundles_post_ra>
